<compile_context>
chip_gen: v5e
topology: v5e:2x2
jax: 0.10.0
libtpu: 0.0.40
codegen_flags: <defaults>
</compile_context>

<pallas_src>
import math

import jax
import jax.numpy as jnp
from jax.experimental import pallas as pl
from jax.experimental.pallas import tpu as pltpu


_TARGET_BLOCK_BYTES = 8 * 1024 * 1024    # ~8 MiB streamed input block per grid step
_VMEM_LIMIT_BYTES = 40 * 1024 * 1024     # 2 x 8 MiB double-buffer + output + headroom


def _cdiv(a, b):
    return -(-a // b)


def _pick_lane(n):
    """Largest lane width in {512,256,128} dividing n (prefer one leaving >= 8 rows)."""
    for lane in (512, 256, 128):
        if n % lane == 0 and n // lane >= 8:
            return lane
    for lane in (512, 256, 128):
        if n % lane == 0:
            return lane
    return None


def _make_sumsq_kernel(tile_r, lane, rows, tiles_per_split, mask_needed):
    """Accumulate per-lane partial sums of x^2 into the resident (8, lane) output block."""

    def kernel(x_ref, o_ref):
        i = pl.program_id(0)   # split (TensorCore) axis
        k = pl.program_id(1)   # reduction axis (last in grid)

        @pl.when(k == 0)
        def _():
            o_ref[...] = jnp.zeros_like(o_ref)

        x = x_ref[...].astype(jnp.float32)     # HBM stays native dtype; upcast in-kernel
        xx = x * x

        if mask_needed:
            # Only the tail of the last (partial) block and any redundant blocks
            # introduced by rounding num_tiles up to a multiple of `splits` carry
            # invalid data.  Sublane-varying iota is lane-replicated in vregs, so
            # this stays pure VPU work (no pad copy of the input in HBM).
            block = i * tiles_per_split + k
            row0 = block * tile_r
            rid = jax.lax.broadcasted_iota(jnp.int32, xx.shape, 0) + row0
            xx = jnp.where(rid < rows, xx, 0.0)

        if tile_r % 8 == 0:
            # Fold the tile down to one vreg row-group with pure VPU adds: groups of
            # 8 rows align with the f32 sublane tile, so the reshape is a no-copy view.
            o_ref[...] += xx.reshape(-1, 8, lane).sum(axis=0)
        else:
            # Tiny-input path (rows < 8): single block, one cross-sublane reduce.
            o_ref[0:1, :] = o_ref[0:1, :] + jnp.sum(xx, axis=0, keepdims=True)

    return kernel


def negative_gaussian_loss(x, size, *, num_splits=1):
    """x: (B, *size) array -> scalar negative summed standard-normal log prob.

    num_splits: optional leading "parallel" grid axis to shard the streaming
    reduction across TensorCores.  Default 1 (v5e/v6e have a single TC per chip).
    # TODO(synk): on v7x, confirm "parallel" actually shards across both TCs
    # (else switch to CORE_PARALLEL / pl.core_map) before defaulting to 2 there.
    """
    dim = 1
    for s in size:
        dim *= int(s)
    batch = int(x.shape[0])
    n = batch * dim

    itemsize = jnp.dtype(x.dtype).itemsize
    flat = x.reshape(-1)              # contiguous -> free reshape, no copy

    lane = _pick_lane(n)
    n_work = n
    if lane is None:
        # Rare ragged case (n not a multiple of 128): pad to the next 128 boundary.
        # This is the only path that copies the input; zero padding is exact for a
        # sum of squares and the normalization constant below uses the true n.
        n_work = _cdiv(n, 128) * 128
        flat = jnp.pad(flat, (0, n_work - n))
        lane = _pick_lane(n_work)

    rows = n_work // lane
    x2d = flat.reshape(rows, lane)    # free reshape: zero-copy lane-dense view

    if rows >= 8:
        target_rows = max(8, (_TARGET_BLOCK_BYTES // (lane * itemsize)) // 8 * 8)
        tile_r = max(8, (min(target_rows, rows) // 8) * 8)
    else:
        tile_r = rows                 # whole (tiny) array in a single block

    num_tiles = _cdiv(rows, tile_r)
    splits = max(1, min(int(num_splits), num_tiles))
    tiles_per_split = _cdiv(num_tiles, splits)
    covered_rows = splits * tiles_per_split * tile_r
    mask_needed = covered_rows > rows          # ragged last block or redundant blocks
    last_tile = num_tiles - 1

    kernel = _make_sumsq_kernel(tile_r, lane, rows, tiles_per_split, mask_needed)

    partials = pl.pallas_call(
        kernel,
        out_shape=jax.ShapeDtypeStruct((8 * splits, lane), jnp.float32),
        grid_spec=pltpu.PrefetchScalarGridSpec(
            num_scalar_prefetch=0,
            grid=(splits, tiles_per_split),
            in_specs=[pl.BlockSpec(
                (tile_r, lane),
                # Clamp so redundant blocks (from rounding num_tiles up to a multiple
                # of `splits`) stay in bounds; the in-kernel row mask zeroes them.
                lambda i, k, _t=tiles_per_split, _l=last_tile: (
                    jnp.minimum(i * _t + k, _l), 0))],
            out_specs=pl.BlockSpec((8, lane), lambda i, k: (i, 0)),
        ),
        compiler_params=pltpu.CompilerParams(
            dimension_semantics=("parallel", "arbitrary"),
            vmem_limit_bytes=_VMEM_LIMIT_BYTES,
        ),
        cost_estimate=pl.CostEstimate(
            flops=2 * n,
            transcendentals=0,
            bytes_accessed=n_work * itemsize + 8 * splits * lane * 4,
        ),
    )(x2d)

    # Tiny final reduce + Gaussian normalization constant in plain JAX.
    # batch*dim stays a Python int so the constant is computed exactly before one f32 cast.
    const = jnp.float32(0.5 * float(n) * math.log(2.0 * math.pi))
    return 0.5 * jnp.sum(partials) + const


def negative_gaussian_loss_ref(x, size):
    dim = 1
    for s in size:
        dim *= int(s)
    x2d = x.reshape(x.shape[0], dim).astype(jnp.float32)
    logp = -0.5 * jnp.sum(x2d * x2d, axis=-1) - 0.5 * dim * jnp.log(2.0 * jnp.pi)
    return -jnp.sum(logp, axis=-1)


# TODO(synk): the module's sample() method (drawing from the standard normal) is not
# implemented here; only the forward (negative summed log-prob) is kernelized.


if __name__ == "__main__":
    key = jax.random.PRNGKey(0)
    k1, k2, k3 = jax.random.split(key, 3)

    # Case 1: lane-aligned shape (typical flow input) -> clean zero-copy path.
    B, C, H, W = 2, 4, 16, 16
    size1 = (C, H, W)
    x1 = jax.random.normal(k1, (B, C, H, W), dtype=jnp.float32)
    out1 = jax.block_until_ready(negative_gaussian_loss(x1, size1))
    ref1 = negative_gaussian_loss_ref(x1, size1)
    assert jnp.allclose(out1, ref1, rtol=1e-5, atol=1e-3), (out1, ref1)

    # Case 2: row count not a multiple of the tile -> exercises the in-kernel tail
    # mask (no host-side pad copy).
    size2 = (5, 16, 16)
    x2 = jax.random.normal(k2, (3,) + size2, dtype=jnp.float32)
    out2 = jax.block_until_ready(negative_gaussian_loss(x2, size2))
    ref2 = negative_gaussian_loss_ref(x2, size2)
    assert jnp.allclose(out2, ref2, rtol=1e-5, atol=1e-3), (out2, ref2)

    # Case 3: bf16 input -> in-kernel f32 upcast path.
    x3 = jax.random.normal(k3, (B, C, H, W), dtype=jnp.bfloat16)
    out3 = jax.block_until_ready(negative_gaussian_loss(x3, size1))
    ref3 = negative_gaussian_loss_ref(x3, size1)
    assert jnp.allclose(out3, ref3, rtol=1e-4, atol=1e-2), (out3, ref3)

    print("KERNEL_OK")
</pallas_src>

<mosaic_0001>
module attributes {stable_mosaic.version = 11 : i64} {
  func.func @kernel(%arg0: i32, %arg1: i32, %arg2: memref<8x256xf32, #tpu.memory_space<vmem>>, %arg3: memref<8x256xf32, #tpu.memory_space<vmem>>) attributes {dimension_semantics = [#tpu.dimension_semantics<parallel>, #tpu.dimension_semantics<arbitrary>], iteration_bounds = array<i64: 1, 1>, scalar_prefetch = 0 : i64, scratch_operands = 0 : i64, tpu.core_type = #tpu.core_type<tc>, window_params = [{transform_indices = @transform_0, window_bounds = array<i64: 8, 256>}, {transform_indices = @transform_1, window_bounds = array<i64: 8, 256>}]} {
    %c0_i32 = arith.constant 0 : i32
    %0 = arith.cmpi eq, %arg1, %c0_i32 : i32
    %1 = arith.extui %0 : i1 to i32
    %c0_i32_0 = arith.constant 0 : i32
    %2 = arith.cmpi ne, %1, %c0_i32_0 : i32
    scf.if %2 {
      %cst_6 = arith.constant 0.000000e+00 : f32
      %10 = vector.broadcast %cst_6 : f32 to vector<8x256xf32>
      %c0_7 = arith.constant 0 : index
      %c0_8 = arith.constant 0 : index
      %11 = vector.load %arg3[%c0_7, %c0_8] : memref<8x256xf32, #tpu.memory_space<vmem>>, vector<8x256xf32>
      tpu.vector_store %arg3[%c0_7, %c0_8], %10 {strides = array<i32>} : memref<8x256xf32, #tpu.memory_space<vmem>>, vector<8x256xf32>,
    } else {
    }
    %c0 = arith.constant 0 : index
    %c0_1 = arith.constant 0 : index
    %3 = vector.load %arg2[%c0, %c0_1] : memref<8x256xf32, #tpu.memory_space<vmem>>, vector<8x256xf32>
    %4 = arith.mulf %3, %3 : vector<8x256xf32>
    %c0_2 = arith.constant 0 : index
    %c0_3 = arith.constant 0 : index
    %5 = vector.load %arg3[%c0_2, %c0_3] : memref<8x256xf32, #tpu.memory_space<vmem>>, vector<8x256xf32>
    %6 = vector.shape_cast %4 : vector<8x256xf32> to vector<1x8x256xf32>
    %cst = arith.constant dense<0.000000e+00> : vector<8x256xf32>
    %7 = vector.multi_reduction <add>, %6, %cst [0] : vector<1x8x256xf32> to vector<8x256xf32>
    %8 = arith.addf %5, %7 : vector<8x256xf32>
    %c0_4 = arith.constant 0 : index
    %c0_5 = arith.constant 0 : index
    %9 = vector.load %arg3[%c0_4, %c0_5] : memref<8x256xf32, #tpu.memory_space<vmem>>, vector<8x256xf32>
    tpu.vector_store %arg3[%c0_4, %c0_5], %8 {strides = array<i32>} : memref<8x256xf32, #tpu.memory_space<vmem>>, vector<8x256xf32>,
    return
  }
  func.func @transform_0(%arg0: i32, %arg1: i32) -> (i32, i32) {
    %c1_i32 = arith.constant 1 : i32
    %0 = arith.muli %arg0, %c1_i32 : i32
    %1 = arith.addi %0, %arg1 : i32
    %c0_i32 = arith.constant 0 : i32
    %2 = arith.minsi %1, %c0_i32 : i32
    %c0_i32_0 = arith.constant 0 : i32
    %c0_i32_1 = arith.constant 0 : i32
    return %2, %c0_i32_0 : i32, i32
  }
  func.func @transform_1(%arg0: i32, %arg1: i32) -> (i32, i32) {
    %c0_i32 = arith.constant 0 : i32
    %c0_i32_0 = arith.constant 0 : i32
    return %arg0, %c0_i32 : i32, i32
  }
}

</mosaic_0001>

<bundles_post_ra>
// kernel: tpu_custom_call.1
= control target key start
LH: loop header
LB: loop body
LE: loop exit
PB: predicated region body
PF: predicated region fallthrough
CT: control target
= control target key end

     0   :  { %6 = vsyncpa [#allocation3], 0  ;;  %s142_s0 = inlined_call_operand.hbm [shape: f32[8,256], index: 0, kind: input, shape index: {}]   ;;  %s143_s1 = inlined_call_operand.hbm [shape: f32[8,256], index: 1, kind: output, shape index: {}]  }
   0x1   :  { %7 = vsyncpa [#allocation4], 0  ;;  %s19_s8 = sshll.u32 %s142_s0, 4  ;;  %s124_s9 = smov [#allocation2]   ;;  %s20_s8 = int_to_ptr.hbm [resolvable:$true] %s19_s8 }
   0x2   :  { %s21_s10 = sshll.u32 %s124_s9, 4  ;;  %s22_s10 = int_to_ptr.vmem [resolvable:$true] %s21_s10 }
   0x3   :  { %24 = dma.hbm_to_vmem [thread:$0]  %s20_s8, 256, %s22_s10, [#allocation3]  }
   0x4   :  { %120 = dma.done.wait [#allocation3], 256  }
   0x5   :  { %121 = vsyncadd [#allocation3], 4294967040  ;;  %v38_v0 = vld [vmem:[#allocation2] sm:$0xff]  ;;  %v39_v1 = vld [vmem:[#allocation2 + $0x8] sm:$0xff]  ;;  %s125_s11 = smov [#allocation5]   ;;  %s57_s15 = sshll.u32 %s143_s1, 4  ;;  %s58_s15 = int_to_ptr.hbm [resolvable:$true] %s57_s15 }
   0x6   :  { %v40_v2 = vmul.f32 %v38_v0, %v38_v0  ;;  %v41_v3 = vmul.f32 %v39_v1, %v39_v1  ;;  %s55_s12 = sshll.u32 %s125_s11, 4  ;;  %s56_s12 = int_to_ptr.vmem [resolvable:$true] %s55_s12 }
   0x8   :  { %48 = vst [vmem:[#allocation5] sm:$0xff] %v40_v2 }
   0x9   :  { %49 = vst [vmem:[#allocation5 + $0x8] sm:$0xff] %v41_v3 }
   0xa   :  { %60 = dma.vmem_to_hbm [thread:$0]  %s56_s12, 256, %s58_s15, [#allocation4]  }
   0xb   :  { %122 = dma.done.wait [#allocation4], 256  }
   0xc   :  { %123 = vsyncadd [#allocation4], 4294967040 }
   0xd   :  { %65 = vsyncpa [#allocation3], 1 }
   0xe   :  { %66 = vsyncpa [#allocation4], 1 }

</bundles_post_ra>
